<compile_context>
chip_gen: v7x
topology: tpu7x:2x2x1
jax: 0.10.0
libtpu: 0.0.40
codegen_flags: <defaults>
</compile_context>

<pallas_src>
import functools

import jax
import jax.numpy as jnp
from jax.experimental import pallas as pl
from jax.experimental.pallas import tpu as pltpu

_LANES = 128
_SQRT_HALF = 0.7071067811865476
_TILE_CAP_ROWS = 1024  # 512 KiB f32 / 256 KiB bf16 per block; ~2 MiB double-buffered in+out


def _round_up(v, m):
    return ((v + m - 1) // m) * m


def _num_tensorcores():
    """v7x has 2 TensorCores per chip; v5e/v6e have 1."""
    try:
        kind = jax.devices()[0].device_kind.lower()
    except Exception:
        return 1
    return 2 if "v7" in kind else 1


def _erf_approx(z):
    """Abramowitz & Stegun 7.1.26 erf approximation, |error| <= ~2e-7."""
    a1, a2, a3, a4, a5 = 0.254829592, -0.284496736, 1.421413741, -1.453152027, 1.061405429
    p = 0.3275911
    za = jnp.abs(z)
    d = 1.0 + p * za
    # approx reciprocal on the EUP + one Newton refinement instead of a full f32 divide.
    r = pl.reciprocal(d, approx=True)
    t = r * (2.0 - d * r)
    poly = ((((a5 * t + a4) * t + a3) * t + a2) * t + a1) * t
    y = 1.0 - poly * jnp.exp(-za * za)
    return jnp.where(z < 0.0, -y, y)


def activation_mix_kernel(params_ref, x_ref, o_ref):
    """Fused weighted activation mixture.

    params_ref: SMEM f32[7] = [c_sin, c_tanh, c_relu, c_gelu, c_softplus, c_elu, omega]
                where c_i = softmax(raw)[i] * balance[i].
    x_ref/o_ref: VMEM [tile_rows, 128] tiles in the input's native dtype.
    """
    x = x_ref[...].astype(jnp.float32)

    c_sin = params_ref[0]
    c_tanh = params_ref[1]
    c_relu = params_ref[2]
    c_gelu = params_ref[3]
    c_soft = params_ref[4]
    c_elu = params_ref[5]
    omega = params_ref[6]

    relu_x = jnp.maximum(x, 0.0)
    e_negabs = jnp.exp(-jnp.abs(x))  # shared transcendental for Softplus and ELU

    acc = c_sin * jnp.sin(omega * x)                                      # MySin
    acc = acc + c_tanh * jnp.tanh(x)                                      # Tanh
    acc = acc + c_relu * relu_x                                           # ReLU
    # exact erf-based GELU (torch.nn.GELU() default)
    acc = acc + c_gelu * (0.5 * x * (1.0 + _erf_approx(x * _SQRT_HALF)))  # GELU
    # Softplus(beta=1), stable form: max(x,0) + log(1 + exp(-|x|))
    acc = acc + c_soft * (relu_x + jnp.log(1.0 + e_negabs))               # Softplus
    # ELU(alpha=1): x if x > 0 else exp(x) - 1   (exp(-|x|) == exp(x) on that branch)
    acc = acc + c_elu * jnp.where(x > 0.0, x, e_negabs - 1.0)             # ELU

    o_ref[...] = acc.astype(o_ref.dtype)


def _choose_tiling(rows, num_tc):
    if num_tc <= 1:
        # single TensorCore: one block as large as the cap allows
        tile_rows = min(_TILE_CAP_ROWS, _round_up(rows, 16))
    else:
        # 2-TC (v7x): even number of equal-sized blocks, capped per-block size
        nb = max(num_tc, num_tc * pl.cdiv(rows, num_tc * _TILE_CAP_ROWS))
        tile_rows = min(_TILE_CAP_ROWS, _round_up(pl.cdiv(rows, nb), 16))
    return tile_rows, pl.cdiv(rows, tile_rows)


@functools.partial(jax.jit, static_argnames=("activation",))
def activation_block_forward(x, activate_weights_raw, balance_weights, omega,
                             activation="mixed"):
    """JAX/Pallas port of ActivationBlock.forward.

    x: arbitrary-shaped float array (kept in its native dtype end-to-end).
    activate_weights_raw: f32[6] raw weights (softmax applied here, as in __init__).
    balance_weights: f32[6] strategy-dependent constants / parameters.
    omega: scalar (MySin frequency parameter).
    """
    if activation == "original":
        # plain exact GELU path (no mixture) — trivially handled by XLA.
        return 0.5 * x * (1.0 + jax.scipy.special.erf(x * _SQRT_HALF))

    # my_softmax(raw) * balance -> combined per-activation coefficients.
    raw = activate_weights_raw.astype(jnp.float32)
    ew = jnp.exp(raw - jnp.max(raw))                 # max-subtracted, same result, no overflow
    coeffs = (ew / jnp.sum(ew)) * balance_weights.astype(jnp.float32)
    params = jnp.concatenate(
        [coeffs, jnp.reshape(jnp.asarray(omega, jnp.float32), (1,))]
    ).astype(jnp.float32)                            # f32[7]

    orig_shape = x.shape
    flat = x.reshape(-1)                             # native dtype, no astype pass
    n = flat.shape[0]
    rows = pl.cdiv(n, _LANES)
    padded = rows * _LANES != n
    if padded:                                       # rare ragged-lane case (<128 elems pad)
        flat = jnp.pad(flat, (0, rows * _LANES - n))
    x2d = flat.reshape(rows, _LANES)                 # lane-dense slab

    tile_rows, num_blocks = _choose_tiling(rows, _num_tensorcores())

    out2d = pl.pallas_call(
        activation_mix_kernel,
        out_shape=jax.ShapeDtypeStruct((rows, _LANES), x.dtype),
        grid_spec=pltpu.PrefetchScalarGridSpec(
            num_scalar_prefetch=0,
            grid=(num_blocks,),
            in_specs=[
                pl.BlockSpec(memory_space=pltpu.MemorySpace.SMEM),    # params f32[7]
                pl.BlockSpec((tile_rows, _LANES), lambda i: (i, 0)),  # x block
            ],
            out_specs=pl.BlockSpec((tile_rows, _LANES), lambda i: (i, 0)),
        ),
        compiler_params=pltpu.CompilerParams(
            dimension_semantics=("parallel",)),
    )(params, x2d)

    if padded:
        return out2d.reshape(-1)[:n].reshape(orig_shape)
    return out2d.reshape(orig_shape)


if __name__ == "__main__":
    key = jax.random.PRNGKey(0)
    kx, kw = jax.random.split(key)

    # small shapes consistent with an element-wise activation block
    B, C, H, W = 2, 4, 16, 16
    x = jax.random.normal(kx, (B, C, H, W), dtype=jnp.float32)

    # activate_weights_raw = torch.rand(6); strategy == 1 balance weights; omega = 1.0
    activate_weights_raw = jax.random.uniform(kw, (6,), dtype=jnp.float32)
    balance_weights = jnp.array([10.0, 10.0, 1.0, 1.0, 1.0, 1.0], dtype=jnp.float32)
    omega = jnp.float32(1.0)

    out = activation_block_forward(x, activate_weights_raw, balance_weights, omega)
    out = jax.block_until_ready(out)

    # pure-JAX reference (exact erf GELU, standard softplus/elu)
    ew = jnp.exp(activate_weights_raw)
    c = (ew / jnp.sum(ew)) * balance_weights
    erf = jax.scipy.special.erf
    ref = (c[0] * jnp.sin(omega * x)
           + c[1] * jnp.tanh(x)
           + c[2] * jnp.maximum(x, 0.0)
           + c[3] * (0.5 * x * (1.0 + erf(x * _SQRT_HALF)))
           + c[4] * jax.nn.softplus(x)
           + c[5] * jnp.where(x > 0.0, x, jnp.expm1(x)))

    assert out.shape == x.shape and out.dtype == x.dtype
    assert jnp.allclose(out, ref, atol=2e-5, rtol=2e-5), "mismatch vs reference"

    print("KERNEL_OK")
</pallas_src>

<mosaic_0001>
module attributes {stable_mosaic.version = 11 : i64} {
  func.func @activation_mix_kernel(%arg0: i32, %arg1: memref<7xf32, #tpu.memory_space<smem>>, %arg2: memref<16x128xf32, #tpu.memory_space<vmem>>, %arg3: memref<16x128xf32, #tpu.memory_space<vmem>>) attributes {dimension_semantics = [#tpu.dimension_semantics<parallel>], iteration_bounds = array<i64: 1>, scalar_prefetch = 0 : i64, scratch_operands = 0 : i64, tpu.core_type = #tpu.core_type<tc>, window_params = [{transform_indices = @transform_0, window_bounds = array<i64: 7>}, {transform_indices = @transform_1, window_bounds = array<i64: 16, 128>}, {transform_indices = @transform_2, window_bounds = array<i64: 16, 128>}]} {
    %c0 = arith.constant 0 : index
    %c0_0 = arith.constant 0 : index
    %0 = vector.load %arg2[%c0, %c0_0] : memref<16x128xf32, #tpu.memory_space<vmem>>, vector<16x128xf32>
    %c0_1 = arith.constant 0 : index
    %1 = memref.load %arg1[%c0_1] : memref<7xf32, #tpu.memory_space<smem>>
    %c1 = arith.constant 1 : index
    %2 = memref.load %arg1[%c1] : memref<7xf32, #tpu.memory_space<smem>>
    %c2 = arith.constant 2 : index
    %3 = memref.load %arg1[%c2] : memref<7xf32, #tpu.memory_space<smem>>
    %c3 = arith.constant 3 : index
    %4 = memref.load %arg1[%c3] : memref<7xf32, #tpu.memory_space<smem>>
    %c4 = arith.constant 4 : index
    %5 = memref.load %arg1[%c4] : memref<7xf32, #tpu.memory_space<smem>>
    %c5 = arith.constant 5 : index
    %6 = memref.load %arg1[%c5] : memref<7xf32, #tpu.memory_space<smem>>
    %c6 = arith.constant 6 : index
    %7 = memref.load %arg1[%c6] : memref<7xf32, #tpu.memory_space<smem>>
    %cst = arith.constant 0.000000e+00 : f32
    %8 = vector.broadcast %cst : f32 to vector<16x128xf32>
    %9 = arith.maximumf %0, %8 : vector<16x128xf32>
    %10 = math.absf %0 : vector<16x128xf32>
    %cst_2 = arith.constant 0.000000e+00 : f32
    %11 = vector.broadcast %cst_2 : f32 to vector<16x128xf32>
    %12 = arith.subf %11, %10 : vector<16x128xf32>
    %13 = math.exp %12 : vector<16x128xf32>
    %14 = vector.broadcast %7 : f32 to vector<16x128xf32>
    %15 = arith.mulf %14, %0 : vector<16x128xf32>
    %16 = math.sin %15 : vector<16x128xf32>
    %17 = vector.broadcast %1 : f32 to vector<16x128xf32>
    %18 = arith.mulf %17, %16 : vector<16x128xf32>
    %19 = math.tanh %0 : vector<16x128xf32>
    %20 = vector.broadcast %2 : f32 to vector<16x128xf32>
    %21 = arith.mulf %20, %19 : vector<16x128xf32>
    %22 = arith.addf %18, %21 : vector<16x128xf32>
    %23 = vector.broadcast %3 : f32 to vector<16x128xf32>
    %24 = arith.mulf %23, %9 : vector<16x128xf32>
    %25 = arith.addf %22, %24 : vector<16x128xf32>
    %cst_3 = arith.constant 5.000000e-01 : f32
    %26 = vector.broadcast %cst_3 : f32 to vector<16x128xf32>
    %27 = arith.mulf %26, %0 : vector<16x128xf32>
    %cst_4 = arith.constant 0.707106769 : f32
    %28 = vector.broadcast %cst_4 : f32 to vector<16x128xf32>
    %29 = arith.mulf %0, %28 : vector<16x128xf32>
    %30 = math.absf %29 : vector<16x128xf32>
    %cst_5 = arith.constant 0.327591091 : f32
    %31 = vector.broadcast %cst_5 : f32 to vector<16x128xf32>
    %32 = arith.mulf %31, %30 : vector<16x128xf32>
    %cst_6 = arith.constant 1.000000e+00 : f32
    %33 = vector.broadcast %cst_6 : f32 to vector<16x128xf32>
    %34 = arith.addf %33, %32 : vector<16x128xf32>
    %35 = tpu.reciprocal %34 {approx = true} : vector<16x128xf32> -> vector<16x128xf32>
    %36 = arith.mulf %34, %35 : vector<16x128xf32>
    %cst_7 = arith.constant 2.000000e+00 : f32
    %37 = vector.broadcast %cst_7 : f32 to vector<16x128xf32>
    %38 = arith.subf %37, %36 : vector<16x128xf32>
    %39 = arith.mulf %35, %38 : vector<16x128xf32>
    %cst_8 = arith.constant 1.06140542 : f32
    %40 = vector.broadcast %cst_8 : f32 to vector<16x128xf32>
    %41 = arith.mulf %40, %39 : vector<16x128xf32>
    %cst_9 = arith.constant -1.45315206 : f32
    %42 = vector.broadcast %cst_9 : f32 to vector<16x128xf32>
    %43 = arith.addf %41, %42 : vector<16x128xf32>
    %44 = arith.mulf %43, %39 : vector<16x128xf32>
    %cst_10 = arith.constant 1.42141378 : f32
    %45 = vector.broadcast %cst_10 : f32 to vector<16x128xf32>
    %46 = arith.addf %44, %45 : vector<16x128xf32>
    %47 = arith.mulf %46, %39 : vector<16x128xf32>
    %cst_11 = arith.constant -0.284496725 : f32
    %48 = vector.broadcast %cst_11 : f32 to vector<16x128xf32>
    %49 = arith.addf %47, %48 : vector<16x128xf32>
    %50 = arith.mulf %49, %39 : vector<16x128xf32>
    %cst_12 = arith.constant 0.254829586 : f32
    %51 = vector.broadcast %cst_12 : f32 to vector<16x128xf32>
    %52 = arith.addf %50, %51 : vector<16x128xf32>
    %53 = arith.mulf %52, %39 : vector<16x128xf32>
    %cst_13 = arith.constant 0.000000e+00 : f32
    %54 = vector.broadcast %cst_13 : f32 to vector<16x128xf32>
    %55 = arith.subf %54, %30 : vector<16x128xf32>
    %56 = arith.mulf %55, %30 : vector<16x128xf32>
    %57 = math.exp %56 : vector<16x128xf32>
    %58 = arith.mulf %53, %57 : vector<16x128xf32>
    %cst_14 = arith.constant 1.000000e+00 : f32
    %59 = vector.broadcast %cst_14 : f32 to vector<16x128xf32>
    %60 = arith.subf %59, %58 : vector<16x128xf32>
    %cst_15 = arith.constant 0.000000e+00 : f32
    %61 = vector.broadcast %cst_15 : f32 to vector<16x128xf32>
    %62 = arith.cmpf olt, %29, %61 : vector<16x128xf32>
    %cst_16 = arith.constant 0.000000e+00 : f32
    %63 = vector.broadcast %cst_16 : f32 to vector<16x128xf32>
    %64 = arith.subf %63, %60 : vector<16x128xf32>
    %65 = arith.select %62, %64, %60 : vector<16x128xi1>, vector<16x128xf32>
    %cst_17 = arith.constant 1.000000e+00 : f32
    %66 = vector.broadcast %cst_17 : f32 to vector<16x128xf32>
    %67 = arith.addf %66, %65 : vector<16x128xf32>
    %68 = arith.mulf %27, %67 : vector<16x128xf32>
    %69 = vector.broadcast %4 : f32 to vector<16x128xf32>
    %70 = arith.mulf %69, %68 : vector<16x128xf32>
    %71 = arith.addf %25, %70 : vector<16x128xf32>
    %cst_18 = arith.constant 1.000000e+00 : f32
    %72 = vector.broadcast %cst_18 : f32 to vector<16x128xf32>
    %73 = arith.addf %72, %13 : vector<16x128xf32>
    %74 = math.log %73 : vector<16x128xf32>
    %75 = arith.addf %9, %74 : vector<16x128xf32>
    %76 = vector.broadcast %5 : f32 to vector<16x128xf32>
    %77 = arith.mulf %76, %75 : vector<16x128xf32>
    %78 = arith.addf %71, %77 : vector<16x128xf32>
    %cst_19 = arith.constant 0.000000e+00 : f32
    %79 = vector.broadcast %cst_19 : f32 to vector<16x128xf32>
    %80 = arith.cmpf ogt, %0, %79 : vector<16x128xf32>
    %cst_20 = arith.constant 1.000000e+00 : f32
    %81 = vector.broadcast %cst_20 : f32 to vector<16x128xf32>
    %82 = arith.subf %13, %81 : vector<16x128xf32>
    %83 = arith.select %80, %0, %82 : vector<16x128xi1>, vector<16x128xf32>
    %84 = vector.broadcast %6 : f32 to vector<16x128xf32>
    %85 = arith.mulf %84, %83 : vector<16x128xf32>
    %86 = arith.addf %78, %85 : vector<16x128xf32>
    %c0_21 = arith.constant 0 : index
    %c0_22 = arith.constant 0 : index
    %87 = vector.load %arg3[%c0_21, %c0_22] : memref<16x128xf32, #tpu.memory_space<vmem>>, vector<16x128xf32>
    tpu.vector_store %arg3[%c0_21, %c0_22], %86 {strides = array<i32>} : memref<16x128xf32, #tpu.memory_space<vmem>>, vector<16x128xf32>,
    return
  }
  func.func @transform_0(%arg0: i32) -> i32 {
    %c0_i32 = arith.constant 0 : i32
    %c0_i32_0 = arith.constant 0 : i32
    return %c0_i32 : i32
  }
  func.func @transform_1(%arg0: i32) -> (i32, i32) {
    %c0_i32 = arith.constant 0 : i32
    %c0_i32_0 = arith.constant 0 : i32
    return %arg0, %c0_i32 : i32, i32
  }
  func.func @transform_2(%arg0: i32) -> (i32, i32) {
    %c0_i32 = arith.constant 0 : i32
    %c0_i32_0 = arith.constant 0 : i32
    return %arg0, %c0_i32 : i32, i32
  }
}

</mosaic_0001>

<bundles_post_ra>
// kernel: activation_block_forward.1
= control target key start
LH: loop header
LB: loop body
LE: loop exit
PB: predicated region body
PF: predicated region fallthrough
CT: control target
= control target key end

     0   :  { %7 = vsyncpa [#allocation3], 0  ;;  %s661_s0 = inlined_call_operand.vmem [shape: f32[7], index: 0, kind: input, shape index: {}]   ;;  %s662_s1 = inlined_call_operand.vmem [shape: f32[16,128], index: 1, kind: input, shape index: {}]   ;;  %s663_s2 = inlined_call_operand.vmem [shape: f32[16,128], index: 2, kind: output, shape index: {}]  }
   0x1   :  { %s14_s11 = sshll.u32 %s661_s0, 4  ;;  %s15_s11 = int_to_ptr.vmem [resolvable:$true] %s14_s11 }
   0x2   :  { %s422_s12 = scalar_lea.vmem %s15_s11, 16  ;;  %p427_p1 = scmp.lt.s32.totalorder %s15_s11, %s15_s11 }
   0x3   :  { %p423_p0 = scmp.ne.s32.totalorder %s15_s11, %s422_s12  ;;  %p428_p2 = scmp.lt.s32.totalorder %s422_s12, %s422_s12 }
   0x5   :  { %p429_p3 = por %p428_p2, %p427_p1 }
   0x7   :  { %p430_p4 = pnand %p429_p3, %p423_p0 }
   0x9   :  { %433 = shalt.err (!%p430_p4)
}
   0xa   :  { %s436_s13 = smov [#allocation2]  }
   0xb   :  { %17 = dma.vmem_to_smem %s15_s11, 16, %s436_s13, [#allocation3]  }
   0xc   :  { %434 = dma.done.wait [#allocation3], 16  }
   0xd   :  { %435 = vsyncadd [#allocation3], 4294967280 }
   0xe   :  { %23 = sfence }
   0xf   :  { %s368_s14 = sld [smem:[#allocation2 + $0x6]]  ;;  %v464_v0 = vld [vmem:[%s662_s1] sm:$0xff]  ;;  %v469_v1 = vld [vmem:[%s662_s1 + $0x8] sm:$0xff]  ;;  %v437_v35 = vmov 683565275   ;;  %s608_s1 = sld [smem:[#allocation2 + $0x1]] }
  0x10   :  { %v472_v2 = vmul.f32 0.70710677, %v464_v0  ;;  %v475_v3 = vmul.f32 0.70710677, %v469_v1  ;;  %v438_v37 = vmov 2475754826  }
  0x11   :  { %v439_v39 = vmov 2131351028   ;;  %v440_v41 = vmov 2102212464   ;;  %v441_v43 = vmov 920167782  }
  0x12   :  { %v484_v7 = vand.u32 2147483647, %v472_v2  ;;  %v487_v8 = vand.u32 2147483647, %v475_v3  ;;  %v442_v51 = vmov 1326507024  }
  0x13   :  { %s610_s18 = sld [smem:[#allocation2 + $0x2]]  ;;  %s622_s19 = sld [smem:[#allocation2]] }
  0x14   :  { %v275_v14 = vmul.f32 0.3275911, %v484_v7  ;;  %v276_v15 = vmul.f32 0.3275911, %v487_v8  ;;  %s625_s20 = sld [smem:[#allocation2 + $0x3]]  ;;  %s632_s21 = sld [smem:[#allocation2 + $0x4]] }
  0x15   :  { %v43_v4 = vstv %s368_s14  ;;  %s636_s22 = sld [smem:[#allocation2 + $0x5]] }
  0x16   :  { %v478_v5 = vmul.f32 %v43_v4, %v464_v0  ;;  %v481_v6 = vmul.f32 %v43_v4, %v469_v1  ;;  %v499_v22 = vadd.f32 1.0, %v275_v14  ;;  %v501_v26 = vadd.f32 1.0, %v276_v15 }
  0x18   :  { %v46_v9 = vand.u32 2147483647, %v478_v5  ;;  %v49_v10 = vand.u32 2139095040, %v478_v5  ;;  %v150_v11 = vand.u32 2147483647, %v481_v6  ;;  %v153_v12 = vand.u32 2139095040, %v481_v6 }
  0x19   :  { %394 = vrcp.f32 %v499_v22  ;;  %vm48_vm14 = vcmp.lt.s32.totalorder %v478_v5, 0 }
  0x1a   :  { %v50_v13 = vshrl.u32 %v49_v10, 23  ;;  %v53_v16 = vand.u32 8388607, %v46_v9  ;;  %v154_v17 = vshrl.u32 %v153_v12, 23  ;;  %v157_v18 = vand.u32 8388607, %v150_v11 }
  0x1b   :  { %396 = vrcp.f32 %v501_v26  ;;  %vm593_vm15 = vcmp.le.f32.partialorder %v46_v9, 0.7853982 }
  0x1c   :  { %v369_v19 = vadd.s32 4294967169, %v50_v13  ;;  %v373_v20 = vadd.s32 4294967169, %v154_v17  ;;  %v54_v23 = vor.u32 8388608, %v53_v16  ;;  %v158_v24 = vor.u32 8388608, %v157_v18 }
  0x1e   :  { %v56_v21 = vadd.s32 1, %v369_v19  ;;  %v160_v25 = vadd.s32 1, %v373_v20  ;;  %v504_v31 = vshll.u32 %v54_v23, 8  ;;  %v506_v33 = vshll.u32 %v158_v24, 8 }
  0x20   :  { %vm57_vm0 = vcmp.gt.s32.totalorder %v56_v21, 0  ;;  %vm161_vm1 = vcmp.gt.s32.totalorder %v160_v25, 0 }
  0x21   :  { %v58_v27 = vsel %vm57_vm0, %v56_v21, 0  ;;  %v162_v30 = vsel %vm161_vm1, %v160_v25, 0  ;;  %vm152_vm0 = vcmp.lt.s32.totalorder %v481_v6, 0  ;;  %vm317_vm1 = vcmp.lt.f32.partialorder %v472_v2, 0.0 }
  0x22   :  { %v59_v28 = vshrl.u32 %v58_v27, 5  ;;  %v60_v29 = vand.u32 31, %v58_v27  ;;  %v164_v32 = vand.u32 31, %v162_v30  ;;  %v509_v45 = vshrl.u32 %v162_v30, 5 }
  0x23   :  { %v395_v14 = vpop.eup %394 }
  0x24   :  { %v61_v34 = vsub.s32 32, %v60_v29  ;;  %v63_v36 = vshll.u32 %v437_v35, %v60_v29  ;;  %v66_v38 = vshll.u32 %v438_v37, %v60_v29  ;;  %v69_v40 = vshll.u32 %v439_v39, %v60_v29 }
  0x25   :  { %v72_v42 = vshll.u32 %v440_v41, %v60_v29  ;;  %v75_v44 = vshll.u32 %v441_v43, %v60_v29  ;;  %vm78_vm2 = vcmp.lt.s32.totalorder %v59_v28, 1  ;;  %vm79_vm3 = vcmp.lt.s32.totalorder %v59_v28, 2  ;;  %v397_v19 = vpop.eup %396 }
  0x26   :  { %v62_v46 = vshrl.u32 %v437_v35, %v61_v34  ;;  %v64_v47 = vshrl.u32 %v438_v37, %v61_v34  ;;  %v67_v48 = vshrl.u32 %v439_v39, %v61_v34  ;;  %v70_v49 = vshrl.u32 %v440_v41, %v61_v34 }
  0x27   :  { %v73_v50 = vshrl.u32 %v441_v43, %v61_v34  ;;  %v76_v52 = vshrl.u32 %v442_v51, %v61_v34  ;;  %vm81_vm4 = vcmp.lt.s32.totalorder %v59_v28, 4  ;;  %v165_v56 = vsub.s32 32, %v164_v32 }
  0x28   :  { %v65_v53 = vor.u32 %v64_v47, %v63_v36  ;;  %v68_v54 = vor.u32 %v67_v48, %v66_v38  ;;  %v71_v55 = vor.u32 %v70_v49, %v69_v40  ;;  %vm80_vm5 = vcmp.lt.s32.totalorder %v59_v28, 3 }
  0x29   :  { %v74_v57 = vor.u32 %v73_v50, %v72_v42  ;;  %v77_v58 = vor.u32 %v76_v52, %v75_v44  ;;  %v167_v59 = vshll.u32 %v437_v35, %v164_v32  ;;  %v170_v13 = vshll.u32 %v438_v37, %v164_v32 }
  0x2a   :  { %v82_v60 = vsel %vm78_vm2, %v62_v46, %v65_v53  ;;  %v83_v61 = vsel %vm81_vm4, %v71_v55, 2102212464  ;;  %v86_v62 = vsel %vm78_vm2, %v65_v53, %v68_v54  ;;  %v90_v63 = vsel %vm78_vm2, %v68_v54, %v71_v55 }
  0x2b   :  { %v84_v4 = vsel %vm80_vm5, %v68_v54, %v83_v61  ;;  %v87_v10 = vsel %vm81_vm4, %v74_v57, 920167782  ;;  %v91_v12 = vsel %vm81_vm4, %v77_v58, 1326507024  ;;  %v166_v17 = vshrl.u32 %v437_v35, %v165_v56 }
  0x2c   :  { %v88_v15 = vsel %vm80_vm5, %v71_v55, %v87_v10  ;;  %v92_v16 = vsel %vm80_vm5, %v74_v57, %v91_v12  ;;  %v168_v18 = vshrl.u32 %v438_v37, %v165_v56  ;;  %v85_v20 = vsel %vm79_vm3, %v82_v60, %v84_v4 }
  0x2d   :  { %v89_v21 = vsel %vm79_vm3, %v86_v62, %v88_v15  ;;  %v93_v23 = vsel %vm79_vm3, %v90_v63, %v92_v16  ;;  %v171_v24 = vshrl.u32 %v439_v39, %v165_v56  ;;  %v173_v36 = vshll.u32 %v439_v39, %v164_v32 }
  0x2e   :  { %v518_v25 = vmul.u32.u64.low %v504_v31, %v93_v23  ;;  %v519_v27 = vmul.u32.u64.high %v504_v31, %v93_v23, %v518_v25  ;;  %v522_v29 = vmul.u32.u64.low %v504_v31, %v89_v21  ;;  %v523_v30 = vmul.u32.u64.high %v504_v31, %v89_v21, %v522_v29 }
  0x2f   :  { %v169_v34 = vor.u32 %v168_v18, %v167_v59  ;;  %v172_v35 = vor.u32 %v171_v24, %v170_v13  ;;  %v174_v37 = vshrl.u32 %v440_v41, %v165_v56  ;;  %v176_v38 = vshll.u32 %v440_v41, %v164_v32 }
  0x30   :  { %v177_v40 = vshrl.u32 %v441_v43, %v165_v56  ;;  %v179_v42 = vshll.u32 %v441_v43, %v164_v32  ;;  %v180_v44 = vshrl.u32 %v442_v51, %v165_v56  ;;  %v101_v28 = vmul.u32 %v504_v31, %v85_v20 }
  0x31   :  { %v175_v46 = vor.u32 %v174_v37, %v173_v36  ;;  %vm182_vm6 = vcmp.lt.s32.totalorder %v509_v45, 1  ;;  %vm183_vm7 = vcmp.lt.s32.totalorder %v509_v45, 2  ;;  %vm103_vm8 = vc.u32 %v519_v27, %v522_v29 }
  0x32   :  { %v104_v47 = vadd.s32 1, %v523_v30  ;;  %v178_v48 = vor.u32 %v177_v40, %v176_v38  ;;  %vm184_vm9 = vcmp.lt.s32.totalorder %v509_v45, 3  ;;  %v181_v39 = vor.u32 %v180_v44, %v179_v42 }
  0x33   :  { %vm185_vm10 = vcmp.lt.s32.totalorder %v509_v45, 4  ;;  %v186_v32 = vsel %vm182_vm6, %v166_v17, %v169_v34  ;;  %v190_v41 = vsel %vm182_vm6, %v169_v34, %v172_v35  ;;  %v194_v50 = vsel %vm182_vm6, %v172_v35, %v175_v46 }
  0x34   :  { %v105_v31 = vsel %vm103_vm8, %v104_v47, %v523_v30  ;;  %v187_v43 = vsel %vm185_vm10, %v175_v46, 2102212464  ;;  %v191_v49 = vsel %vm185_vm10, %v178_v48, 920167782  ;;  %v195_v54 = vsel %vm185_vm10, %v181_v39, 1326507024 }
  0x35   :  { %v106_v51 = vadd.s32 %v105_v31, %v101_v28  ;;  %v188_v52 = vsel %vm184_vm9, %v172_v35, %v187_v43  ;;  %v192_v53 = vsel %vm184_vm9, %v175_v46, %v191_v49  ;;  %v196_v57 = vsel %vm184_vm9, %v178_v48, %v195_v54 }
  0x36   :  { %v189_v55 = vsel %vm183_vm7, %v186_v32, %v188_v52  ;;  %v193_v56 = vsel %vm183_vm7, %v190_v41, %v192_v53  ;;  %v281_v58 = vmul.f32 %v395_v14, %v499_v22  ;;  %v197_v60 = vsel %vm183_vm7, %v194_v50, %v196_v57 }
  0x37   :  { %v107_v59 = vadd.s32 536870912, %v106_v51  ;;  %v543_v61 = vmul.u32.u64.low %v506_v33, %v193_v56  ;;  %v544_v62 = vmul.u32.u64.high %v506_v33, %v193_v56, %v543_v61  ;;  %v282_v10 = vmul.f32 %v397_v19, %v501_v26 }
  0x38   :  { %v548_v63 = vmul.u32.u64.low %v506_v33, %v197_v60  ;;  %v549_v4 = vmul.u32.u64.high %v506_v33, %v197_v60, %v548_v63  ;;  %v283_v13 = vsub.f32 2.0, %v281_v58  ;;  %v35_v22 = vand.u32 2147483647, %v464_v0 }
  0x39   :  { %v552_v12 = vshrl.u32 %v107_v59, 30  ;;  %v205_v15 = vmul.u32 %v506_v33, %v189_v55  ;;  %v284_v45 = vsub.f32 2.0, %v282_v10  ;;  %v208_v17 = vadd.s32 1, %v544_v62 }
  0x3a   :  { %v558_v18 = vmul.f32 %v395_v14, %v283_v13  ;;  %vm207_vm11 = vc.u32 %v549_v4, %v543_v61  ;;  %v305_v26 = vsub.f32 0.0, %v484_v7  ;;  %v37_v33 = vsub.f32 0.0, %v35_v22 }
  0x3b   :  { %v109_v16 = vshll.u32 %v552_v12, 30  ;;  %v562_v20 = vmul.f32 %v397_v19, %v284_v45  ;;  %v209_v23 = vsel %vm207_vm11, %v208_v17, %v544_v62  ;;  %v36_v28 = vand.u32 2147483647, %v469_v1 }
  0x3c   :  { %v287_v24 = vmul.f32 1.0614054, %v558_v18  ;;  %v210_v25 = vadd.s32 %v209_v23, %v205_v15  ;;  %v307_v37 = vmul.f32 %v305_v26, %v484_v7  ;;  %v39_v40 = vmul.f32 1.442695, %v37_v33 }
  0x3d   :  { %v110_v21 = vsub.s32 %v106_v51, %v109_v16  ;;  %v288_v30 = vmul.f32 1.0614054, %v562_v20  ;;  %v306_v47 = vsub.f32 0.0, %v487_v8  ;;  %v38_v49 = vsub.f32 0.0, %v36_v28 }
  0x3e   :  { %v289_v35 = vadd.f32 -1.4531521, %v287_v24  ;;  %v211_v14 = vadd.s32 536870912, %v210_v25  ;;  %v309_v32 = vmul.f32 1.442695, %v307_v37  ;;  %398 = vpow2.f32 %v39_v40 }
  0x3f   :  { %v112_v34 = vsub.s32 0, %v110_v21  ;;  %v290_v36 = vadd.f32 -1.4531521, %v288_v30  ;;  %v102_v50 = vadd.s32 %v522_v29, %v519_v27  ;;  %v308_v51 = vmul.f32 %v306_v47, %v487_v8 }
  0x40   :  { %v291_v19 = vmul.f32 %v289_v35, %v558_v18  ;;  %v570_v42 = vshrl.u32 %v211_v14, 30  ;;  %400 = vpow2.f32 %v309_v32  ;;  %v41_v62 = vmul.f32 1.442695, %v38_v49 }
  0x41   :  { %v370_v38 = vmin.u32 %v112_v34, %v110_v21  ;;  %v292_v44 = vmul.f32 %v290_v36, %v562_v20  ;;  %v311_v27 = vmul.f32 1.442695, %v308_v51  ;;  %v132_v24 = vsub.s32 4, %v552_v12 }
  0x42   :  { %v213_v48 = vshll.u32 %v570_v42, 30  ;;  %v293_v39 = vadd.f32 1.4214138, %v291_v19  ;;  %402 = vpow2.f32 %v41_v62  ;;  %v236_v49 = vsub.s32 4, %v570_v42 }
  0x43   :  { %v114_v46 = vclz %v370_v38  ;;  %v294_v31 = vadd.f32 1.4214138, %v292_v44  ;;  %404 = vpow2.f32 %v311_v27  ;;  %v133_v40 = vsel %vm48_vm14, %v132_v24, %v552_v12 }
  0x44   :  { %v214_v7 = vsub.s32 %v210_v25, %v213_v48  ;;  %v295_v43 = vmul.f32 %v293_v39, %v558_v18  ;;  %v135_v32 = vsel %vm593_vm15, 0, %v133_v40  ;;  %vm617_vm2 = vcmp.le.f32.partialorder %v150_v11, 0.7853982 }
  0x45   :  { %v371_v41 = vadd.s32 4294967294, %v114_v46  ;;  %v296_v59 = vmul.f32 %v294_v31, %v562_v20  ;;  %v139_v51 = vadd.s32 3, %v135_v32  ;;  %vm138_vm6 = vweird.f32 %v478_v5 }
  0x46   :  { %v216_v53 = vsub.s32 0, %v214_v7  ;;  %v297_v54 = vadd.f32 -0.28449672, %v295_v43  ;;  %vm318_vm7 = vcmp.lt.f32.partialorder %v475_v3, 0.0  ;;  %vm345_vm8 = vcmp.gt.f32.partialorder %v464_v0, 0.0 }
  0x47   :  { %vm372_vm12 = vcmp.lt.s32.totalorder %v371_v41, 0  ;;  %v298_v45 = vadd.f32 -0.28449672, %v296_v59  ;;  %v270_v3 = vmul.f32 0.5, %v469_v1 }
  0x48   :  { %v117_v52 = vsel %vm372_vm12, 0, %v371_v41  ;;  %v374_v58 = vmin.u32 %v216_v53, %v214_v7  ;;  %v299_v60 = vmul.f32 %v297_v54, %v558_v18  ;;  %v582_v26 = vpop.eup %398  ;;  %vm242_vm12 = vweird.f32 %v481_v6 }
  0x49   :  { %v118_v55 = vsub.s32 32, %v117_v52  ;;  %v119_v56 = vshll.u32 %v110_v21, %v117_v52  ;;  %v122_v57 = vsub.s32 4294967266, %v117_v52  ;;  %v206_v21 = vadd.s32 %v543_v61, %v549_v4 }
  0x4a   :  { %v218_v13 = vclz %v374_v58  ;;  %v301_v8 = vadd.f32 0.2548296, %v299_v60  ;;  %v401_v30 = vpop.eup %400  ;;  %v300_v36 = vmul.f32 %v298_v45, %v562_v20  ;;  %v332_v38 = vadd.f32 1.0, %v582_v26 }
  0x4b   :  { %v120_v63 = vshrl.u32 %v102_v50, %v118_v55  ;;  %v123_v10 = vadd.s32 127, %v122_v57  ;;  %v140_v58 = vand.u32 3, %v139_v51 }
  0x4c   :  { %v375_v15 = vadd.s32 4294967294, %v218_v13  ;;  %v303_v25 = vmul.f32 %v301_v8, %v558_v18  ;;  %v302_v47 = vadd.f32 0.2548296, %v300_v36  ;;  %406 = vlog2.f32 %v332_v38 }
  0x4d   :  { %v121_v29 = vor.u32 %v120_v63, %v119_v56  ;;  %v124_v22 = vshll.u32 %v123_v10, 23  ;;  %v237_v56 = vsel %vm152_vm0, %v236_v49, %v570_v42  ;;  %v33_v10 = vmax.f32 %v464_v0, 0.0 }
  0x4e   :  { %vm376_vm13 = vcmp.lt.s32.totalorder %v375_v15, 0  ;;  %v313_v44 = vmul.f32 %v401_v30, %v303_v25  ;;  %v304_v50 = vmul.f32 %v302_v47, %v562_v20  ;;  %v239_v60 = vsel %vm617_vm2, 0, %v237_v56 }
  0x4f   :  { %v125_v16 = vor.u32 4788187, %v124_v22  ;;  %v128_v17 = vcvt.s32.f32 %v121_v29  ;;  %v221_v33 = vsel %vm376_vm13, 0, %v375_v15  ;;  %vm145_vm3 = vcmp.eq.s32.totalorder %v140_v58, 2 }
  0x50   :  { %v222_v34 = vsub.s32 32, %v221_v33  ;;  %v223_v35 = vshll.u32 %v214_v7, %v221_v33  ;;  %v226_v14 = vsub.s32 4294967266, %v221_v33  ;;  %v603_v7 = vpop.eup %402  ;;  %v315_v31 = vsub.f32 1.0, %v313_v44 }
  0x51   :  { %v126_v23 = vand.u32 2147483647, %v125_v16  ;;  %v405_v12 = vpop.eup %404  ;;  %v333_v54 = vadd.f32 1.0, %v603_v7  ;;  %v269_v13 = vmul.f32 0.5, %v464_v0  ;;  %vm142_vm4 = vcmp.eq.s32.totalorder %v140_v58, 0 }
  0x52   :  { %v224_v61 = vshrl.u32 %v206_v21, %v222_v34  ;;  %v227_v4 = vadd.s32 127, %v226_v14  ;;  %v319_v53 = vsub.f32 0.0, %v315_v31  ;;  %v314_v57 = vmul.f32 %v405_v12, %v304_v50 }
  0x53   :  { %v129_v37 = vmul.f32 %v128_v17, %v126_v23  ;;  %v243_v22 = vadd.s32 3, %v239_v60  ;;  %vm141_vm5 = vcmp.lt.s32.totalorder %v140_v58, 2  ;;  %v259_v16 = vstv %s608_s1 }
  0x54   :  { %v225_v28 = vor.u32 %v224_v61, %v223_v35  ;;  %v228_v46 = vshll.u32 %v227_v4, 23  ;;  %v321_v62 = vsel %vm317_vm1, %v319_v53, %v315_v31  ;;  %v316_v42 = vsub.f32 1.0, %v314_v57 }
  0x55   :  { %v130_v18 = vxor.u32 2147483648, %v129_v37  ;;  %v323_v8 = vadd.f32 1.0, %v321_v62  ;;  %v264_v17 = vstv %s610_s18  ;;  %v254_v25 = vstv %s622_s19 }
  0x56   :  { %v229_v9 = vor.u32 4788187, %v228_v46  ;;  %v232_v41 = vcvt.s32.f32 %v225_v28  ;;  %v407_v2 = vpop.eup %406  ;;  %v320_v23 = vsub.f32 0.0, %v316_v42  ;;  %v244_v34 = vand.u32 3, %v243_v22 }
  0x57   :  { %v131_v48 = vsel %vm48_vm14, %v130_v18, %v129_v37  ;;  %v335_v24 = vmul.f32 0.6931472, %v407_v2  ;;  %v325_v14 = vmul.f32 %v323_v8, %v269_v13  ;;  %v265_v37 = vmul.f32 %v264_v17, %v33_v10 }
  0x58   :  { %v134_v39 = vsel %vm593_vm15, %v478_v5, %v131_v48  ;;  %v230_v43 = vand.u32 2147483647, %v229_v9  ;;  %v327_v38 = vstv %s625_s20  ;;  %v377_v61 = vadd.f32 -1.0, %v582_v26 }
  0x59   :  { %408 = vcosq.f32 %v134_v39  ;;  %v322_v19 = vsel %vm318_vm7, %v320_v23, %v316_v42  ;;  %v338_v18 = vadd.f32 %v335_v24, %v33_v10  ;;  %v340_v44 = vstv %s632_s21 }
  0x5a   :  { %410 = vsinq.f32 %v134_v39  ;;  %v233_v52 = vmul.f32 %v232_v41, %v230_v43  ;;  %vm249_vm9 = vcmp.eq.s32.totalorder %v244_v34, 2  ;;  %v328_v47 = vmul.f32 %v327_v38, %v325_v14 }
  0x5b   :  { %412 = vtanh.f32 %v464_v0  ;;  %v351_v48 = vstv %s636_s22  ;;  %vm246_vm10 = vcmp.eq.s32.totalorder %v244_v34, 0  ;;  %v324_v9 = vadd.f32 1.0, %v322_v19 }
  0x5c   :  { %v234_v20 = vxor.u32 2147483648, %v233_v52  ;;  %414 = vtanh.f32 %v469_v1  ;;  %v349_v26 = vsel %vm345_vm8, %v464_v0, %v377_v61  ;;  %vm245_vm11 = vcmp.lt.s32.totalorder %v244_v34, 2 }
  0x5d   :  { %416 = vlog2.f32 %v333_v54  ;;  %v341_v12 = vmul.f32 %v340_v44, %v338_v18  ;;  %v34_v43 = vmax.f32 %v469_v1, 0.0  ;;  %v352_v53 = vmul.f32 %v351_v48, %v349_v26 }
  0x5e   :  { %v235_v59 = vsel %vm152_vm0, %v234_v20, %v233_v52  ;;  %v326_v20 = vmul.f32 %v324_v9, %v270_v3  ;;  %v378_v0 = vadd.f32 -1.0, %v603_v7  ;;  %vm346_vm13 = vcmp.gt.f32.partialorder %v469_v1, 0.0 }
  0x5f   :  { %v238_v11 = vsel %vm617_vm2, %v481_v6, %v235_v59  ;;  %v266_v59 = vmul.f32 %v264_v17, %v34_v43 }
  0x60   :  { %418 = vcosq.f32 %v238_v11  ;;  %v329_v6 = vmul.f32 %v327_v38, %v326_v20  ;;  %v350_v62 = vsel %vm346_vm13, %v469_v1, %v378_v0 }
  0x61   :  { %420 = vsinq.f32 %v238_v11  ;;  %v353_v13 = vmul.f32 %v351_v48, %v350_v62 }
  0x63   :  { %v409_v63 = vpop.eup %408 }
  0x64   :  { %v411_v27 = vpop.eup %410  ;;  %v146_v29 = vxor.u32 2147483648, %v409_v63 }
  0x65   :  { %v413_v15 = vpop.eup %412  ;;  %v143_v45 = vxor.u32 2147483648, %v411_v27 }
  0x66   :  { %v147_v21 = vsel %vm145_vm3, %v146_v29, %v411_v27  ;;  %v260_v35 = vmul.f32 %v413_v15, %v259_v16  ;;  %v415_v4 = vpop.eup %414 }
  0x67   :  { %v144_v33 = vsel %vm142_vm4, %v409_v63, %v143_v45  ;;  %v417_v40 = vpop.eup %416  ;;  %v261_v55 = vmul.f32 %v415_v4, %v259_v16 }
  0x68   :  { %v148_v30 = vsel %vm141_vm5, %v144_v33, %v147_v21  ;;  %v337_v50 = vmul.f32 0.6931472, %v417_v40 }
  0x69   :  { %v149_v36 = vsel %vm138_vm6, nan, %v148_v30 }
  0x6a   :  { %v255_v5 = vmul.f32 %v254_v25, %v149_v36  ;;  %v419_v28 = vpop.eup %418  ;;  %v339_v2 = vadd.f32 %v337_v50, %v34_v43 }
  0x6b   :  { %v421_v39 = vpop.eup %420  ;;  %v250_v32 = vxor.u32 2147483648, %v419_v28 }
  0x6c   :  { %v262_v46 = vadd.f32 %v260_v35, %v255_v5  ;;  %v247_v41 = vxor.u32 2147483648, %v421_v39  ;;  %v342_v63 = vmul.f32 %v340_v44, %v339_v2 }
  0x6d   :  { %v251_v49 = vsel %vm249_vm9, %v250_v32, %v421_v39 }
  0x6e   :  { %v267_v31 = vadd.f32 %v265_v37, %v262_v46  ;;  %v248_v51 = vsel %vm246_vm10, %v419_v28, %v247_v41 }
  0x6f   :  { %v252_v54 = vsel %vm245_vm11, %v248_v51, %v251_v49 }
  0x70   :  { %v330_v52 = vadd.f32 %v328_v47, %v267_v31  ;;  %v253_v56 = vsel %vm242_vm12, nan, %v252_v54 }
  0x71   :  { %v256_v58 = vmul.f32 %v254_v25, %v253_v56 }
  0x72   :  { %v343_v57 = vadd.f32 %v341_v12, %v330_v52 }
  0x73   :  { %v263_v60 = vadd.f32 %v261_v55, %v256_v58 }
  0x74   :  { %v354_v11 = vadd.f32 %v352_v53, %v343_v57 }
  0x75   :  { %v268_v42 = vadd.f32 %v266_v59, %v263_v60 }
  0x76   :  { %356 = vst [vmem:[%s663_s2] sm:$0xff] %v354_v11 }
  0x77   :  { %v331_v10 = vadd.f32 %v329_v6, %v268_v42 }
  0x79   :  { %v344_v27 = vadd.f32 %v342_v63, %v331_v10 }
  0x7b   :  { %v355_v7 = vadd.f32 %v353_v13, %v344_v27 }
  0x7d   :  { %357 = vst [vmem:[%s663_s2 + $0x8] sm:$0xff] %v355_v7 }
  0x7e   :  { %362 = vsyncpa [#allocation3], 1 }

</bundles_post_ra>
